<compile_context>
chip_gen: v6e
topology: v6e:2x2x1
jax: 0.10.0
libtpu: 0.0.40
codegen_flags: <defaults>
</compile_context>

<pallas_src>
import jax
import jax.numpy as jnp
from jax.experimental import pallas as pl
from jax.experimental.pallas import tpu as pltpu

BN_EPS = 1e-5
LANE = 128


def _round_up(x, m):
    return (x + m - 1) // m * m


# ---------------------------------------------------------------------------
# Kernel: one (TILE_B, in_dim) batch tile -> (TILE_B, out_dim_padded) logits tile
# ---------------------------------------------------------------------------
def mlp_kernel(x_ref, w1_ref, b1_ref, w2_ref, b2_ref, w3_ref, b3_ref, o_ref):
    # fc1 + ReLU            (dropout = identity in eval mode)
    h = jnp.dot(x_ref[...], w1_ref[...], preferred_element_type=jnp.float32)
    h = jnp.maximum(h + b1_ref[...], 0.0)

    # BN folded into fc2:   fc2(BN(h)) == h @ w2' + b2'   (then ReLU; dropout = identity)
    h = jnp.dot(h.astype(w2_ref.dtype), w2_ref[...], preferred_element_type=jnp.float32)
    h = jnp.maximum(h + b2_ref[...], 0.0)

    # BN folded into fc3:   fc3(BN(h)) == h @ w3' + b3'
    o = jnp.dot(h.astype(w3_ref.dtype), w3_ref[...], preferred_element_type=jnp.float32)
    o_ref[...] = o + b3_ref[...]


# ---------------------------------------------------------------------------
# Wrapper
# ---------------------------------------------------------------------------
def multiclass_classifier_forward(x, fused_params, num_classes, *, tile_b=256):
    """x: (B, input_dim) f32.  fused_params: output of fold_and_pad_params."""
    w1, b1, w2, b2, w3, b3 = fused_params
    B, in_dim = x.shape
    out_p = w3.shape[1]

    # Batch tile: multiple of 16 (bf16 sublane packing), no bigger than (padded) batch.
    tile_b = max(16, _round_up(min(int(tile_b), _round_up(B, 16)), 16))
    B_pad = _round_up(B, tile_b)

    x_p = x.astype(w1.dtype)
    if B_pad != B:
        x_p = jnp.pad(x_p, ((0, B_pad - B), (0, 0)))

    grid = (B_pad // tile_b,)

    def resident(shape):
        # grid-invariant operand: constant block index -> fetched once, stays VMEM-resident
        return pl.BlockSpec(shape, lambda i: (0, 0))

    out = pl.pallas_call(
        mlp_kernel,
        out_shape=jax.ShapeDtypeStruct((B_pad, out_p), jnp.float32),
        grid=grid,
        in_specs=[
            pl.BlockSpec((tile_b, in_dim), lambda i: (i, 0)),   # x: batch-tiled
            resident(w1.shape), resident(b1.shape),
            resident(w2.shape), resident(b2.shape),
            resident(w3.shape), resident(b3.shape),
        ],
        out_specs=pl.BlockSpec((tile_b, out_p), lambda i: (i, 0)),
        compiler_params=pltpu.CompilerParams(
            dimension_semantics=("parallel",),      # batch tiles are independent
            vmem_limit_bytes=32 * 1024 * 1024,      # above v5e's 16 MiB scoped default
        ),
    )(x_p, w1, b1, w2, b2, w3, b3)

    return out[:B, :num_classes]


# ---------------------------------------------------------------------------
# Offline parameter transform: fold BN, pad to 128 lanes, cast weights to bf16
# ---------------------------------------------------------------------------
def fold_and_pad_params(params, *, compute_dtype=jnp.bfloat16):
    (w1, b1, w2, b2, w3, b3, gamma, beta, mean, var) = params

    # eval-mode BN:  BN(h) = h * scale + shift
    inv_std = 1.0 / jnp.sqrt(var + BN_EPS)
    scale = gamma * inv_std                  # (1, H)
    shift = beta - mean * scale              # (1, H)

    # BN(h) @ W + b  ==  h @ (scale^T * W) + (shift @ W + b)   (fold BEFORE padding)
    w2f = scale.reshape(-1, 1) * w2
    b2f = shift @ w2 + b2
    w3f = scale.reshape(-1, 1) * w3
    b3f = shift @ w3 + b3

    in_dim, hid = w1.shape
    out_dim = w3.shape[1]
    hid_p = _round_up(hid, LANE)
    out_p = _round_up(out_dim, LANE)

    def pad2(a, rows, cols):
        return jnp.pad(a, ((0, rows - a.shape[0]), (0, cols - a.shape[1])))

    w1p = pad2(w1, in_dim, hid_p).astype(compute_dtype)
    b1p = pad2(b1, 1, hid_p)
    w2p = pad2(w2f, hid_p, hid_p).astype(compute_dtype)
    b2p = pad2(b2f, 1, hid_p)
    w3p = pad2(w3f, hid_p, out_p).astype(compute_dtype)
    b3p = pad2(b3f, 1, out_p)

    return (w1p, b1p, w2p, b2p, w3p, b3p)


# ---------------------------------------------------------------------------
# References
# ---------------------------------------------------------------------------
def reference_forward(x, params):
    """Pure-f32 eval-mode math of the original PyTorch module."""
    (w1, b1, w2, b2, w3, b3, gamma, beta, mean, var) = params
    inv_std = 1.0 / jnp.sqrt(var + BN_EPS)
    h = jnp.maximum(x @ w1 + b1, 0.0)
    h = (h - mean) * inv_std * gamma + beta
    h = jnp.maximum(h @ w2 + b2, 0.0)
    h = (h - mean) * inv_std * gamma + beta
    return h @ w3 + b3


def reference_forward_fused(x, fused_params, num_classes):
    """Same bf16-operand / f32-accumulation path as the kernel (plain JAX)."""
    w1, b1, w2, b2, w3, b3 = fused_params
    h = jnp.maximum(jnp.dot(x.astype(w1.dtype), w1,
                            preferred_element_type=jnp.float32) + b1, 0.0)
    h = jnp.maximum(jnp.dot(h.astype(w2.dtype), w2,
                            preferred_element_type=jnp.float32) + b2, 0.0)
    o = jnp.dot(h.astype(w3.dtype), w3, preferred_element_type=jnp.float32) + b3
    return o[:, :num_classes]


def init_torch_like_params(key, input_dim, hidden_dim, output_dim):
    """Raw params, PyTorch nn.Linear / nn.BatchNorm1d layout (W stored (in, out))."""
    ks = jax.random.split(key, 10)

    def lin(kw, kb, fan_in, fan_out):
        bound = 1.0 / jnp.sqrt(fan_in)
        w = jax.random.uniform(kw, (fan_in, fan_out), jnp.float32, -bound, bound)
        b = jax.random.uniform(kb, (1, fan_out), jnp.float32, -bound, bound)
        return w, b

    w1, b1 = lin(ks[0], ks[1], input_dim, hidden_dim)
    w2, b2 = lin(ks[2], ks[3], hidden_dim, hidden_dim)
    w3, b3 = lin(ks[4], ks[5], hidden_dim, output_dim)

    gamma = 1.0 + 0.1 * jax.random.normal(ks[6], (1, hidden_dim), jnp.float32)
    beta = 0.1 * jax.random.normal(ks[7], (1, hidden_dim), jnp.float32)
    mean = 0.05 * jax.random.normal(ks[8], (1, hidden_dim), jnp.float32)
    var = 1.0 + 0.1 * jax.random.uniform(ks[9], (1, hidden_dim), jnp.float32)

    return (w1, b1, w2, b2, w3, b3, gamma, beta, mean, var)


if __name__ == "__main__":
    key = jax.random.PRNGKey(0)
    k_x, k_p = jax.random.split(key)

    batch, input_dim, hidden_dim, output_dim = 32, 16, 32, 8
    x = jax.random.normal(k_x, (batch, input_dim), jnp.float32)

    raw_params = init_torch_like_params(k_p, input_dim, hidden_dim, output_dim)
    fused_params = fold_and_pad_params(raw_params)

    # tile_b=16 -> grid=(2,) so the batch pipeline is actually exercised at this size
    out = multiclass_classifier_forward(x, fused_params, output_dim, tile_b=16)
    out = jax.block_until_ready(out)
    assert out.shape == (batch, output_dim)

    # exact-numerics check: same bf16/f32-accum path as the kernel
    ref_fused = reference_forward_fused(x, fused_params, output_dim)
    assert jnp.allclose(out, ref_fused, atol=1e-3, rtol=1e-3), float(
        jnp.max(jnp.abs(out - ref_fused)))

    # semantic check vs. the original f32 eval-mode module math (bf16 tolerance)
    ref = reference_forward(x, raw_params)
    assert jnp.allclose(out, ref, atol=5e-2, rtol=5e-2), float(
        jnp.max(jnp.abs(out - ref)))

    print("KERNEL_OK")
</pallas_src>

<mosaic_0001>
module attributes {stable_mosaic.version = 11 : i64} {
  func.func @mlp_kernel(%arg0: i32, %arg1: memref<16x16xbf16, #tpu.memory_space<vmem>>, %arg2: memref<16x128xbf16, #tpu.memory_space<vmem>>, %arg3: memref<1x128xf32, #tpu.memory_space<vmem>>, %arg4: memref<128x128xbf16, #tpu.memory_space<vmem>>, %arg5: memref<1x128xf32, #tpu.memory_space<vmem>>, %arg6: memref<128x128xbf16, #tpu.memory_space<vmem>>, %arg7: memref<1x128xf32, #tpu.memory_space<vmem>>, %arg8: memref<16x128xf32, #tpu.memory_space<vmem>>) attributes {dimension_semantics = [#tpu.dimension_semantics<parallel>], iteration_bounds = array<i64: 2>, scalar_prefetch = 0 : i64, scratch_operands = 0 : i64, tpu.core_type = #tpu.core_type<tc>, window_params = [{transform_indices = @transform_0, window_bounds = array<i64: 16, 16>}, {pipeline_mode = #tpu.pipeline_mode<synchronous>, transform_indices = @transform_1, window_bounds = array<i64: 16, 128>}, {pipeline_mode = #tpu.pipeline_mode<synchronous>, transform_indices = @transform_2, window_bounds = array<i64: 1, 128>}, {pipeline_mode = #tpu.pipeline_mode<synchronous>, transform_indices = @transform_3, window_bounds = array<i64: 128, 128>}, {pipeline_mode = #tpu.pipeline_mode<synchronous>, transform_indices = @transform_4, window_bounds = array<i64: 1, 128>}, {pipeline_mode = #tpu.pipeline_mode<synchronous>, transform_indices = @transform_5, window_bounds = array<i64: 128, 128>}, {pipeline_mode = #tpu.pipeline_mode<synchronous>, transform_indices = @transform_6, window_bounds = array<i64: 1, 128>}, {transform_indices = @transform_7, window_bounds = array<i64: 16, 128>}]} {
    %c0 = arith.constant 0 : index
    %c0_0 = arith.constant 0 : index
    %0 = vector.load %arg1[%c0, %c0_0] : memref<16x16xbf16, #tpu.memory_space<vmem>>, vector<16x16xbf16>
    %c0_1 = arith.constant 0 : index
    %c0_2 = arith.constant 0 : index
    %1 = vector.load %arg2[%c0_1, %c0_2] : memref<16x128xbf16, #tpu.memory_space<vmem>>, vector<16x128xbf16>
    %cst = arith.constant dense<0.000000e+00> : vector<16x128xf32>
    %2 = tpu.matmul %0, %1, %cst {dimension_numbers = #tpu.dot_dimension_numbers<[1], [0], [0], [1], [0, 0, 1, 1], [], []>} : vector<16x16xbf16>, vector<16x128xbf16>, vector<16x128xf32> -> vector<16x128xf32>
    %c0_3 = arith.constant 0 : index
    %c0_4 = arith.constant 0 : index
    %3 = vector.load %arg3[%c0_3, %c0_4] : memref<1x128xf32, #tpu.memory_space<vmem>>, vector<1x128xf32>
    %4 = vector.broadcast %3 : vector<1x128xf32> to vector<16x128xf32>
    %5 = arith.addf %2, %4 : vector<16x128xf32>
    %cst_5 = arith.constant 0.000000e+00 : f32
    %6 = vector.broadcast %cst_5 : f32 to vector<16x128xf32>
    %7 = arith.maximumf %5, %6 : vector<16x128xf32>
    %8 = arith.truncf %7 : vector<16x128xf32> to vector<16x128xbf16>
    %c0_6 = arith.constant 0 : index
    %c0_7 = arith.constant 0 : index
    %9 = vector.load %arg4[%c0_6, %c0_7] : memref<128x128xbf16, #tpu.memory_space<vmem>>, vector<128x128xbf16>
    %cst_8 = arith.constant dense<0.000000e+00> : vector<16x128xf32>
    %10 = tpu.matmul %8, %9, %cst_8 {dimension_numbers = #tpu.dot_dimension_numbers<[1], [0], [0], [1], [0, 0, 1, 1], [], []>} : vector<16x128xbf16>, vector<128x128xbf16>, vector<16x128xf32> -> vector<16x128xf32>
    %c0_9 = arith.constant 0 : index
    %c0_10 = arith.constant 0 : index
    %11 = vector.load %arg5[%c0_9, %c0_10] : memref<1x128xf32, #tpu.memory_space<vmem>>, vector<1x128xf32>
    %12 = vector.broadcast %11 : vector<1x128xf32> to vector<16x128xf32>
    %13 = arith.addf %10, %12 : vector<16x128xf32>
    %cst_11 = arith.constant 0.000000e+00 : f32
    %14 = vector.broadcast %cst_11 : f32 to vector<16x128xf32>
    %15 = arith.maximumf %13, %14 : vector<16x128xf32>
    %16 = arith.truncf %15 : vector<16x128xf32> to vector<16x128xbf16>
    %c0_12 = arith.constant 0 : index
    %c0_13 = arith.constant 0 : index
    %17 = vector.load %arg6[%c0_12, %c0_13] : memref<128x128xbf16, #tpu.memory_space<vmem>>, vector<128x128xbf16>
    %cst_14 = arith.constant dense<0.000000e+00> : vector<16x128xf32>
    %18 = tpu.matmul %16, %17, %cst_14 {dimension_numbers = #tpu.dot_dimension_numbers<[1], [0], [0], [1], [0, 0, 1, 1], [], []>} : vector<16x128xbf16>, vector<128x128xbf16>, vector<16x128xf32> -> vector<16x128xf32>
    %c0_15 = arith.constant 0 : index
    %c0_16 = arith.constant 0 : index
    %19 = vector.load %arg7[%c0_15, %c0_16] : memref<1x128xf32, #tpu.memory_space<vmem>>, vector<1x128xf32>
    %20 = vector.broadcast %19 : vector<1x128xf32> to vector<16x128xf32>
    %21 = arith.addf %18, %20 : vector<16x128xf32>
    %c0_17 = arith.constant 0 : index
    %c0_18 = arith.constant 0 : index
    %22 = vector.load %arg8[%c0_17, %c0_18] : memref<16x128xf32, #tpu.memory_space<vmem>>, vector<16x128xf32>
    tpu.vector_store %arg8[%c0_17, %c0_18], %21 {strides = array<i32>} : memref<16x128xf32, #tpu.memory_space<vmem>>, vector<16x128xf32>,
    return
  }
  func.func @transform_0(%arg0: i32) -> (i32, i32) {
    %c0_i32 = arith.constant 0 : i32
    %c0_i32_0 = arith.constant 0 : i32
    return %arg0, %c0_i32 : i32, i32
  }
  func.func @transform_1(%arg0: i32) -> (i32, i32) {
    %c0_i32 = arith.constant 0 : i32
    %c0_i32_0 = arith.constant 0 : i32
    %c0_i32_1 = arith.constant 0 : i32
    return %c0_i32, %c0_i32_0 : i32, i32
  }
  func.func @transform_2(%arg0: i32) -> (i32, i32) {
    %c0_i32 = arith.constant 0 : i32
    %c0_i32_0 = arith.constant 0 : i32
    %c0_i32_1 = arith.constant 0 : i32
    return %c0_i32, %c0_i32_0 : i32, i32
  }
  func.func @transform_3(%arg0: i32) -> (i32, i32) {
    %c0_i32 = arith.constant 0 : i32
    %c0_i32_0 = arith.constant 0 : i32
    %c0_i32_1 = arith.constant 0 : i32
    return %c0_i32, %c0_i32_0 : i32, i32
  }
  func.func @transform_4(%arg0: i32) -> (i32, i32) {
    %c0_i32 = arith.constant 0 : i32
    %c0_i32_0 = arith.constant 0 : i32
    %c0_i32_1 = arith.constant 0 : i32
    return %c0_i32, %c0_i32_0 : i32, i32
  }
  func.func @transform_5(%arg0: i32) -> (i32, i32) {
    %c0_i32 = arith.constant 0 : i32
    %c0_i32_0 = arith.constant 0 : i32
    %c0_i32_1 = arith.constant 0 : i32
    return %c0_i32, %c0_i32_0 : i32, i32
  }
  func.func @transform_6(%arg0: i32) -> (i32, i32) {
    %c0_i32 = arith.constant 0 : i32
    %c0_i32_0 = arith.constant 0 : i32
    %c0_i32_1 = arith.constant 0 : i32
    return %c0_i32, %c0_i32_0 : i32, i32
  }
  func.func @transform_7(%arg0: i32) -> (i32, i32) {
    %c0_i32 = arith.constant 0 : i32
    %c0_i32_0 = arith.constant 0 : i32
    return %arg0, %c0_i32 : i32, i32
  }
}

</mosaic_0001>

<bundles_post_ra>
// kernel: tpu_custom_call.1
= control target key start
LH: loop header
LB: loop body
LE: loop exit
PB: predicated region body
PF: predicated region fallthrough
CT: control target
= control target key end

     0   :  { %12 = vsyncpa [#allocation3], 0  ;;  %s1245_s0 = inlined_call_operand.vmem [shape: bf16[32,16], index: 0, kind: input, shape index: {}]   ;;  %s1246_s1 = inlined_call_operand.vmem [shape: bf16[16,128], index: 1, kind: input, shape index: {}]   ;;  %s1247_s2 = inlined_call_operand.vmem [shape: f32[1,128], index: 2, kind: input, shape index: {}]   ;;  %s1248_s3 = inlined_call_operand.hbm [shape: bf16[128,128], index: 3, kind: input, shape index: {}]   ;;  %s1249_s4 = inlined_call_operand.vmem [shape: f32[1,128], index: 4, kind: input, shape index: {}]   ;;  %s1250_s5 = inlined_call_operand.hbm [shape: bf16[128,128], index: 5, kind: input, shape index: {}]   ;;  %s1251_s6 = inlined_call_operand.vmem [shape: f32[1,128], index: 6, kind: input, shape index: {}]   ;;  %s1252_s7 = inlined_call_operand.hbm [shape: f32[32,128], index: 7, kind: output, shape index: {}]  }
   0x1   :  { %13 = vsyncpa [#allocation6], 0 }
   0x2   :  { %14 = vsyncpa [#allocation4], 0 }
   0x3   :  { %16 = vsyncpa [#allocation4 + $0x1], 0  ;;  %s1068_s24 = smov 0   ;;  %s1070_s25 = smov 0  }
   0x4   :  { %s1072_s26 = smov 0   ;;  %s1074_s27 = smov 0  }
   0x5 LB: > { %s1089_s28 = sadd.s32 4294967295, %s1017_s27   ;;  %s708_s29 = sadd.s32 4294967294, %s1017_s27   ;;  %s1017_s27 = sphi %s1074_s27, %s1266_s27   ;;  %s1013_s26 = sphi %s1072_s26, %s1265_s26   ;;  %s1009_s25 = sphi %s1070_s25, %s1264_s25   ;;  %s1005_s24 = sphi %s1068_s24, %s1263_s24  }
   0x6   : > { %s1093_s30 = sadd.s32 1, %s1017_s27   ;;  %s181_s8 = sadd.s32 1, %s1013_s26 }
   0x7   : > { %s178_s9 = ssub.s32 %s1017_s27, %s1093_s30  ;;  %p191_p0 = scmp.ne.s32.totalorder %s1013_s26, %s1009_s25 }
   0x8   : > { %p179_p1 = scmp.eq.s32.totalorder %s178_s9, 0  ;;  %p192_p2 = scmp.eq.s32.totalorder %s1089_s28, 1 }
   0x9   : > { %p197_p3 = scmp.ne.s32.totalorder %s1009_s25, %s1005_s24  ;;  %p198_p4 = scmp.eq.s32.totalorder %s708_s29, 1 }
   0xa   : > { %s1104_s10 = scalar_select %p179_p1, %s1013_s26, %s181_s8  }
   0xb   : > { %p1106_p5 = por %p192_p2, %p191_p0  ;;  %p1110_p6 = por %p198_p4, %p197_p3 }
   0xc   : > { %p709_p7 = scmp.ge.s32.totalorder %s1017_s27, 1  ;;  %p205_p8 = scmp.lt.s32.totalorder %s1017_s27, 3 }
   0xd   : > { %s1255_s12 = scalar_select %p1110_p6, 1, 0 }
   0xe   : > { %p1253_p9 = scmp.eq.s32.totalorder %s1089_s28, 0  ;;  %p1117_p10 = pnand %p709_p7, %p205_p8 }
   0xf   : > { %s1019_s14 = smov [#allocation2]   ;;  %s1020_s17 = smov [#allocation5]  }
  0x10   : > { %s223_s15 = sshll.u32 %s1019_s14, 4  ;;  %p823_p11 = pneg %p1117_p10  ;;  %s224_s15 = int_to_ptr.vmem [resolvable:$true] %s223_s15 }
  0x11   : > { %s239_s18 = sshll.u32 %s1020_s17, 4  ;;  %s908_s19 = scalar_lea.vmem %s224_s15, 1024  ;;  %s240_s18 = int_to_ptr.vmem [resolvable:$true] %s239_s18 }
  0x12   : > { %p1125_p12 = pnand %p1253_p9, %p823_p11  ;;  %p909_p0 = scmp.ne.s32.totalorder %s224_s15, %s908_s19 }
  0x13   : > { %p916_p3 = scmp.lt.s32.totalorder %s224_s15, %s224_s15  ;;  %p917_p4 = scmp.lt.s32.totalorder %s908_s19, %s908_s19 }
  0x14   : > { %p899_p13 = pneg %p1125_p12 }
  0x15   : > { %p918_p7 = por %p917_p4, %p916_p3 }
  0x16   : > { %p911_p1 = pnand %p909_p0, %p899_p13 }
  0x18   : > { %p912_p2 = pneg %p911_p1 }
  0x1a   : > { %p919_p8 = pnand %p918_p7, %p912_p2 }
  0x1c   : > { %922 = shalt.err (!%p919_p8)
}
  0x1d   : > { %s1021_s20 = smov 64   ;;  %s1022_s21 = smov 4  }
  0x1e   : > { %826 = dma.hbm_to_vmem [thread:$0]  (!%p1125_p12), %s1248_s3, 1024, %s224_s15, [#allocation3], %s1021_s20, %s1021_s20, %s1022_s21  }
  0x1f   : > { %s934_s29 = scalar_lea.vmem %s240_s18, 1024  ;;  %p942_p9 = scmp.lt.s32.totalorder %s240_s18, %s240_s18 }
  0x20   : > { %p935_p11 = scmp.ne.s32.totalorder %s240_s18, %s934_s29  ;;  %p943_p6 = scmp.lt.s32.totalorder %s934_s29, %s934_s29 }
  0x22   : > { %p937_p0 = pnand %p935_p11, %p899_p13  ;;  %p944_p3 = por %p943_p6, %p942_p9 }
  0x24   : > { %p938_p1 = pneg %p937_p0 }
  0x26   : > { %p945_p2 = pnand %p944_p3, %p938_p1 }
  0x28   : > { %948 = shalt.err (!%p945_p2)
}
  0x29   : > { %829 = dma.hbm_to_vmem [thread:$0]  (!%p1125_p12), %s1250_s5, 1024, %s240_s18, [#allocation6], %s1021_s20, %s1021_s20, %s1022_s21  }
  0x2a   : > { %267 = sbr.rel (%p1117_p10) target bundleno = 677 (0x2a5), region = 48  ;;  %p1258_p4 = scmp.eq.s32.totalorder (!%p1117_p10), %s1089_s28, 0 }
  0x2f   : > { %992 = dma.done.wait (%p1258_p4), [#allocation3], 1024   ;;  %p1259_p13 = pmov %p1258_p4 }
  0x30   : > { %p1260_p7 = pmov %p1258_p4 }
  0x31   : > { %994 = vsyncadd (%p1259_p13), [#allocation3], 4294966272 }
  0x32   : > { %996 = dma.done.wait (%p1260_p7), [#allocation6], 1024   ;;  %p1261_p6 = pmov %p1258_p4 }
  0x33   : > { %s717_s14 = sshll.u32 %s1089_s28, 1  ;;  %v1023_v0 = vmov 0.0   ;;  %vm1024_vm0 = vmmov 0   ;;  %v879_v1 = vld [vmem:[%s1246_s1] sm:$0xff]   ;;  %vm333_vm1 = vcmask 130048   ;;  %v881_v3 = vld [vmem:[#allocation2 + $0x38] sm:$0xff]  }
  0x34   : > { %998 = vsyncadd (%p1261_p6), [#allocation6], 4294966272  ;;  %767 = vmatprep.subr.bf16.mxu0 %v1023_v0  ;;  %769 = vmatprep.mubr.msk.bf16.mxu0 %vm1024_vm0, %v1023_v0  ;;  %p304_p9 = scmp.lt.s32.totalorder %s717_s14, 3  ;;  %v882_v4 = vld [vmem:[#allocation2 + $0x30] sm:$0xff]   ;;  %v883_v5 = vld [vmem:[#allocation2 + $0x28] sm:$0xff]   ;;  %s300_s29 = sand.u32 1, %s1009_s25  }
  0x35   : > { %773 = vmatprep.subr.bf16.mxu1 %v1023_v0  ;;  %789 = vmatprep.mubr.msk.bf16.mxu1 %vm1024_vm0, %v1023_v0  ;;  %v884_v6 = vld [vmem:[#allocation2 + $0x20] sm:$0xff]   ;;  %v885_v7 = vld [vmem:[#allocation2 + $0x18] sm:$0xff]   ;;  %v886_v8 = vld [vmem:[#allocation2 + $0x10] sm:$0xff]   ;;  %s716_s8 = sshll.u32 %s300_s29, 4  ;;  %s746_s16 = sshll.u32 %s1089_s28, 8 }
  0x36   : > { %s1268_s14 = smov (!%p304_p9, %s717_s14), 3  ;;  %768 = vmatpush3.bf16.msra.mxu0 %v879_v1  ;;  %774 = vmatpush3.bf16.msra.mxu1 %v881_v3  ;;  %v887_v9 = vld [vmem:[#allocation2 + $0x8] sm:$0xff]   ;;  %v888_v10 = vld [vmem:[#allocation2] sm:$0xff]   ;;  %v889_v11 = vld [vmem:[#allocation5 + $0x38] sm:$0xff]   ;;  %s1203_s19 = scalar_lea.hbm %s1252_s7, %s746_s16 }
  0x37   : > { %s718_s13 = sshll.u32 %s1268_s14, 2  ;;  %793 = vmatprep.subr.bf16.mxu0 %v1023_v0  ;;  %775 = vmatprep.subr.bf16.mxu1 %v1023_v0  ;;  %v890_v12 = vld [vmem:[#allocation5 + $0x30] sm:$0xff]   ;;  %v891_v13 = vld [vmem:[#allocation5 + $0x28] sm:$0xff]   ;;  %v892_v14 = vld [vmem:[#allocation5 + $0x20] sm:$0xff]   ;;  %s1205_s20 = scalar_lea.sflag [#allocation4], %s300_s29 }
  0x38   : > { %s307_s17 = scalar_lea.vmem %s1245_s0, %s718_s13  ;;  %v893_v15 = vld [vmem:[#allocation5 + $0x18] sm:$0xff]   ;;  %v719_v16 = vld [vmem:[%s1247_s2] ss:$0 sm:$0xff]  ;;  %v894_v26 = vld [vmem:[#allocation5 + $0x10] sm:$0xff]   ;;  %s302_s13 = scalar_lea.vmem [#allocation7], %s716_s8 }
  0x39   : > { %v880_v2 = vld [vmem:[%s307_s17] sm:$0xff]   ;;  %v895_v27 = vld [vmem:[#allocation5 + $0x8] sm:$0xff]   ;;  %s624_s15 = sshll.u32 %s302_s13, 4  ;;  %s1025_s28 = smov [#allocation7]   ;;  %s1198_s15 = int_to_ptr.vmem [resolvable:$true] %s624_s15 }
  0x3a   : > { %770 = vmatmul.mubr.msk.bf16.vlgmr.msra.gmra.mxu0 %vm333_vm1, %v880_v2  ;;  %776 = vmatpush3.bf16.msra.mxu1 %v882_v4  ;;  %v896_v28 = vld [vmem:[#allocation5] sm:$0xff]   ;;  %s949_s21 = scalar_lea.vmem %s1198_s15, 256  ;;  %s953_s22 = sshll.u32 %s1025_s28, 4  ;;  %s954_s22 = int_to_ptr.vmem [resolvable:$false] %s953_s22 }
  0x3b   : > { %809 = vmatprep.mubr.msk.bf16.mxu0 %vm1024_vm0, %v1023_v0  ;;  %777 = vmatprep.subr.bf16.mxu1 %v1023_v0  ;;  %v723_v29 = vld [vmem:[%s1249_s4] ss:$0 sm:$0xff]  ;;  %p950_p10 = scmp.ne.s32.totalorder %s1198_s15, %s949_s21  ;;  %s955_s23 = scalar_lea.vmem %s954_s22, 512 }
  0x3c   : > { %794 = vmatpush3.bf16.msra.mxu0 %v889_v11  ;;  %v732_v39 = vld [vmem:[%s1251_s6] ss:$0 sm:$0xff]  ;;  %p956_p11 = scmp.lt.s32.totalorder %s1198_s15, %s954_s22  ;;  %p957_p0 = scmp.lt.s32.totalorder %s955_s23, %s949_s21 }
  0x3d   : > { %795 = vmatprep.subr.bf16.mxu0 %v1023_v0  ;;  %p951_p12 = pnand %p950_p10, %p1106_p5 }
  0x3e   : > { %778 = vmatpush3.bf16.msra.mxu1 %v883_v5  ;;  %p958_p1 = por %p957_p0, %p956_p11 }
  0x3f   : > { %779 = vmatprep.subr.bf16.mxu1 %v1023_v0  ;;  %p952_p8 = pneg %p951_p12 }
  0x40   : > { %796 = vmatpush3.bf16.msra.mxu0 %v890_v12 }
  0x41   : > { %797 = vmatprep.subr.bf16.mxu0 %v1023_v0  ;;  %p959_p3 = pnand %p958_p1, %p952_p8 }
  0x42   : > { %780 = vmatpush3.bf16.msra.mxu1 %v884_v6 }
  0x43   : > { %781 = vmatprep.subr.bf16.mxu1 %v1023_v0 }
  0x44   : > { %798 = vmatpush3.bf16.msra.mxu0 %v891_v13 }
  0x45   : > { %799 = vmatprep.subr.bf16.mxu0 %v1023_v0 }
  0x46   : > { %782 = vmatpush3.bf16.msra.mxu1 %v885_v7 }
  0x47   : > { %783 = vmatprep.subr.bf16.mxu1 %v1023_v0 }
  0x48   : > { %800 = vmatpush3.bf16.msra.mxu0 %v892_v14 }
  0x49   : > { %801 = vmatprep.subr.bf16.mxu0 %v1023_v0 }
  0x4a   : > { %784 = vmatpush3.bf16.msra.mxu1 %v886_v8 }
  0x4b   : > { %785 = vmatprep.subr.bf16.mxu1 %v1023_v0 }
  0x4c   : > { %802 = vmatpush3.bf16.msra.mxu0 %v893_v15 }
  0x4d   : > { %803 = vmatprep.subr.bf16.mxu0 %v1023_v0 }
  0x4e   : > { %786 = vmatpush3.bf16.msra.mxu1 %v887_v9 }
  0x4f   : > { %787 = vmatprep.subr.bf16.mxu1 %v1023_v0 }
  0x50   : > { %804 = vmatpush3.bf16.msra.mxu0 %v894_v26 }
  0x51   : > { %805 = vmatprep.subr.bf16.mxu0 %v1023_v0 }
  0x52   : > { %788 = vmatpush3.bf16.msra.mxu1 %v888_v10 }
  0x54   : > { %806 = vmatpush3.bf16.msra.mxu0 %v895_v27 }
  0x55   : > { %807 = vmatprep.subr.bf16.mxu0 %v1023_v0 }
  0x58   : > { %808 = vmatpush3.bf16.msra.mxu0 %v896_v28 }
  0xfa   : > { %v371_v17 = vpop.f32.mrf.mxu0 }
  0xfb   : > { %v372_v19 = vadd.f32 %v719_v16, %v371_v17 }
  0xfc   : > { %v771_v18 = vpop.f32.mrf.mxu0 }
  0xfd   : > { %v378_v23 = vmax.f32 %v372_v19, 0.0 }
  0xfe   : > { %v374_v20 = vpop.f32.mrf.mxu0 }
  0xff   : > { %v375_v21 = vadd.f32 %v719_v16, %v374_v20 }
 0x100   : > { %v772_v22 = vpop.f32.mrf.mxu0 }
 0x101   : > { %v379_v24 = vmax.f32 %v375_v21, 0.0 }
 0x103   : > { %v380_v25 = vpack.c.bf16 %v379_v24, %v378_v23 }
 0x105   : > { %790 = vmatmul.mubr.bf16.vlgmr.msra.gmra.mxu1 %v380_v25 }
 0x1c5   : > { %v486_v30 = vpop.f32.mrf.mxu1 }
 0x1c6   : > { %v487_v32 = vadd.f32 %v723_v29, %v486_v30 }
 0x1c7   : > { %v791_v31 = vpop.f32.mrf.mxu1 }
 0x1c8   : > { %v493_v36 = vmax.f32 %v487_v32, 0.0 }
 0x1c9   : > { %v489_v33 = vpop.f32.mrf.mxu1 }
 0x1ca   : > { %v490_v34 = vadd.f32 %v723_v29, %v489_v33 }
 0x1cb   : > { %v792_v35 = vpop.f32.mrf.mxu1 }
 0x1cc   : > { %v494_v37 = vmax.f32 %v490_v34, 0.0 }
 0x1ce   : > { %v495_v38 = vpack.c.bf16 %v494_v37, %v493_v36 }
 0x1d0   : > { %810 = vmatmul.mubr.bf16.vlgmr.msra.gmra.mxu0 %v495_v38 }
 0x290   : > { %v601_v40 = vpop.f32.mrf.mxu0 }
 0x291   : > { %v602_v41 = vadd.f32 %v732_v39, %v601_v40 }
 0x292   : > { %v811_v42 = vpop.f32.mrf.mxu0 }
 0x293   : > { %608 = vst [vmem:[%s302_s13] sm:$0xff] %v602_v41 }
 0x294   : > { %v604_v43 = vpop.f32.mrf.mxu0 }
 0x295   : > { %v605_v44 = vadd.f32 %v732_v39, %v604_v43 }
 0x296   : > { %v812_v45 = vpop.f32.mrf.mxu0 }
 0x297   : > { %609 = vst [vmem:[%s302_s13 + $0x8] sm:$0xff] %v605_v44 }
 0x298   : > { %962 = shalt.err (!%p959_p3)
}
 0x299   : > { %s963_s29 = scalar_lea.hbm %s1203_s19, 256  ;;  %s967_s14 = scalar_lea.hbm %s1252_s7, 512 }
 0x29a   : > { %p964_p2 = scmp.ne.s32.totalorder %s1203_s19, %s963_s29  ;;  %p968_p7 = scmp.lt.s32.totalorder %s1203_s19, %s1252_s7 }
 0x29b   : > { %p969_p6 = scmp.lt.s32.totalorder %s967_s14, %s963_s29 }
 0x29c   : > { %p965_p4 = pnand %p964_p2, %p1106_p5 }
 0x29d   : > { %p970_p9 = por %p969_p6, %p968_p7 }
 0x29e   : > { %p966_p13 = pneg %p965_p4 }
 0x2a0   : > { %p971_p10 = pnand %p970_p9, %p966_p13 }
 0x2a2   : > { %974 = shalt.err (!%p971_p10)
}
 0x2a3   : > { %s1026_s17 = smov 128   ;;  %s1027_s18 = smov 8  }
 0x2a4   : > { %821 = dma.vmem_to_hbm [thread:$0]  (%p1106_p5), %s1198_s15, 256, %s1203_s19, %s1205_s20, %s1026_s17, %s1026_s17, %s1027_s18  }
 0x2a5 PF: > { %p838_p12 = scmp.ge.s32.totalorder %s1017_s27, 2  ;;  %s639_s21 = sand.u32 1, %s1005_s24  }
 0x2a6   : > { %p1262_p8 = scmp.ne.s32.totalorder %s1255_s12, 0  ;;  %s640_s28 = scalar_lea.sflag [#allocation4], %s639_s21 }
 0x2a8   : > { %p831_p11 = pnand %p838_p12, %p1262_p8 }
 0x2aa   : > { %p832_p0 = pneg %p831_p11 }
 0x2ac   : > { %1000 = dma.done.wait (%p832_p0), %s640_s28, 256  }
 0x2ad   : > { %1002 = vsyncadd (%p832_p0), %s640_s28, 4294967040  ;;  %p19_p1 = scmp.ge.s32.totalorder %s1093_s30, 4   ;;  %s1263_s24 = smov %s1009_s25 }
 0x2ae   : > { %s1264_s25 = smov %s1013_s26  ;;  %s1265_s26 = smov %s1104_s10 }
 0x2af   : > { %s1266_s27 = smov %s1093_s30  ;;  %21 = sbr.rel (!%p19_p1) target bundleno = 5 (0x5), region = 92 }
 0x2b4   :  { %645 = vsyncpa [#allocation3], 1 }
 0x2b5   :  { %647 = vsyncpa [#allocation3 + $0x1], 1 }
 0x2b6   :  { %648 = vsyncpa [#allocation6], 1 }
 0x2b7   :  { %649 = vsyncpa [#allocation4], 1 }
 0x2b8   :  { %651 = vsyncpa [#allocation4 + $0x1], 1 }

</bundles_post_ra>
